<compile_context>
chip_gen: v5e
topology: v5e:2x2
jax: 0.10.0
libtpu: 0.0.40
codegen_flags: <defaults>
</compile_context>

<pallas_src>
import math
import numpy as np
import jax
import jax.numpy as jnp
from jax.experimental import pallas as pl
from jax.experimental.pallas import tpu as pltpu

_VMEM_LIMIT_BYTES = 32 * 1024 * 1024   # safe scoped-VMEM budget on v5e / v6e / v7x


def _round_up(x, m):
    return (x + m - 1) // m * m


# ---------------------------------------------------------------------------
# Fused GATv2 projection:  x @ [Wl | Wr]  ->  (x_l, x_r)   (bf16 MXU, f32 accumulate)
# ---------------------------------------------------------------------------
def _make_proj_kernel(ho):
    def kernel(x_ref, w_ref, xl_ref, xr_ref):
        acc = jnp.dot(x_ref[...], w_ref[...], preferred_element_type=jnp.float32)
        xl_ref[...] = acc[:, :ho].astype(xl_ref.dtype)
        xr_ref[...] = acc[:, ho:].astype(xr_ref.dtype)
    return kernel


def _project(x_pad, w_cat, ho, *, block_n):
    n_pad, f_in = x_pad.shape
    bn = min(block_n, n_pad)
    assert n_pad % bn == 0
    return pl.pallas_call(
        _make_proj_kernel(ho),
        out_shape=(jax.ShapeDtypeStruct((n_pad, ho), jnp.bfloat16),
                   jax.ShapeDtypeStruct((n_pad, ho), jnp.bfloat16)),
        grid_spec=pltpu.PrefetchScalarGridSpec(
            num_scalar_prefetch=0,
            grid=(n_pad // bn,),
            in_specs=[pl.BlockSpec((bn, f_in), lambda i: (i, 0)),
                      pl.BlockSpec((f_in, 2 * ho), lambda i: (0, 0))],
            out_specs=[pl.BlockSpec((bn, ho), lambda i: (i, 0)),
                       pl.BlockSpec((bn, ho), lambda i: (i, 0))],
        ),
        compiler_params=pltpu.CompilerParams(
            dimension_semantics=("parallel",),
            vmem_limit_bytes=_VMEM_LIMIT_BYTES),
    )(x_pad, w_cat)


# ---------------------------------------------------------------------------
# Block-sparse tiled GATv2 attention kernel with online softmax over nonzero src blocks
# ---------------------------------------------------------------------------
def _make_attn_kernel(heads, out_per_head, concat, apply_relu):
    H, O = heads, out_per_head

    def kernel(nblk_ref, blk_ref, att_ref,            # scalar-prefetch refs (SMEM)
               xr_ref, xlt_ref, adj_ref, bias_ref,    # VMEM inputs
               out_ref, m_sc, l_sc, acc_sc):          # output + scratch
        i = pl.program_id(0)       # dst-node tile
        k = pl.program_id(1)       # index into this dst tile's nonzero-src-block list

        @pl.when(k == 0)
        def _init():
            m_sc[...] = jnp.full(m_sc.shape, -1e30, jnp.float32)
            l_sc[...] = jnp.zeros(l_sc.shape, jnp.float32)
            acc_sc[...] = jnp.zeros(acc_sc.shape, jnp.float32)

        # Grid steps past this dst tile's nonzero-block count are padding (their index_maps
        # re-fetch an already-resident block); skip all vector work on them.
        @pl.when(k < nblk_ref[i])
        def _update():
            mask = adj_ref[...] > 0                        # (Td, Ts), from int8 0/1
            xr = xr_ref[...].astype(jnp.float32)           # (Td, H*O)  target-side features
            xlt = xlt_ref[...].astype(jnp.float32)         # (H*O, Ts)  src nodes on lanes

            for h in range(H):
                # GATv2 score, lane-dense over src, unrolled over the small per-head channels.
                # TODO(synk): move the per-channel sublane broadcast of xlt[c, :] onto the vld
                # slots via a stride-0 load (pl.ds(c, Td, stride=0)) instead of an XLU splat.
                e = jnp.zeros(mask.shape, jnp.float32)
                for c in range(h * O, (h + 1) * O):
                    t = xr[:, c:c + 1] + xlt[c:c + 1, :]   # (Td, Ts)
                    t = jnp.maximum(t, 0.2 * t)            # leaky_relu(0.2)
                    e = e + att_ref[c] * t
                e = jnp.where(mask, e, -1e30)

                # Online softmax.  Masked lanes underflow to 0 in exp once the running max is
                # finite; anything accumulated before a row saw its first real edge is erased
                # by scale = exp(-1e30 - m_new) = 0 (self loops guarantee a real edge exists).
                m_prev = m_sc[:, h:h + 1]
                m_new = jnp.maximum(m_prev, jnp.max(e, axis=1, keepdims=True))
                scale = jnp.exp(m_prev - m_new)
                p = jnp.exp(e - m_new)
                l_sc[:, h:h + 1] = (scale * l_sc[:, h:h + 1]
                                    + jnp.sum(p, axis=1, keepdims=True))
                acc_sc[:, h * O:(h + 1) * O] = (
                    scale * acc_sc[:, h * O:(h + 1) * O]
                    + jax.lax.dot_general(
                        p, xlt[h * O:(h + 1) * O, :],
                        (((1,), (1,)), ((), ())),          # contract over src (NT matmul)
                        preferred_element_type=jnp.float32))
                m_sc[:, h:h + 1] = m_new

        @pl.when(k == pl.num_programs(1) - 1)
        def _finalize():
            cols = []
            for h in range(H):
                # guard: padded / edge-free dst rows have an all-zero denominator
                inv = 1.0 / jnp.maximum(l_sc[:, h:h + 1], 1e-20)
                cols.append(acc_sc[:, h * O:(h + 1) * O] * inv)   # (Td, O)
            if concat:
                out = jnp.concatenate(cols, axis=-1)              # (Td, H*O)
            else:
                out = cols[0]
                for c in cols[1:]:
                    out = out + c
                out = out * (1.0 / H)                             # (Td, O)
            out = out + bias_ref[...]
            if apply_relu:
                out = jnp.maximum(out, 0.0)
            out_ref[...] = out.astype(out_ref.dtype)

    return kernel


def gatv2_layer(x_pad, adj_pad, nblk, blk_idx, w_cat, att, bias, *, heads, out_per_head,
                concat, apply_relu, out_dtype, td, ts):
    n_pad = x_pad.shape[0]
    H, O = heads, out_per_head
    ho = H * O
    f_out = ho if concat else O
    assert n_pad % td == 0 and n_pad % ts == 0

    # Projections hoisted out of the attention kernel (computed once per layer, fused MXU pass).
    xl, xr = _project(x_pad, w_cat, ho, block_n=td)      # (N_pad, H*O) bf16 each
    xlt = xl.T                                           # (H*O, N_pad): tiny transpose pass

    max_nnz = blk_idx.shape[1]
    grid = (n_pad // td, max_nnz)                        # (dst tiles, nonzero src blocks)

    att_flat = att.reshape(-1).astype(jnp.float32)       # SMEM scalars
    bias_row = bias.reshape(1, f_out).astype(jnp.float32)

    return pl.pallas_call(
        _make_attn_kernel(H, O, concat, apply_relu),
        out_shape=jax.ShapeDtypeStruct((n_pad, f_out), out_dtype),
        grid_spec=pltpu.PrefetchScalarGridSpec(
            num_scalar_prefetch=3,                       # nblk, blk_idx, att  -> SMEM
            grid=grid,
            in_specs=[
                pl.BlockSpec((td, ho), lambda i, k, nblk, blk, att: (i, 0)),          # x_r
                pl.BlockSpec((ho, ts), lambda i, k, nblk, blk, att: (0, blk[i, k])),   # x_l^T
                pl.BlockSpec((td, ts), lambda i, k, nblk, blk, att: (i, blk[i, k])),   # adj int8
                pl.BlockSpec((1, f_out), lambda i, k, nblk, blk, att: (0, 0)),         # bias
            ],
            out_specs=pl.BlockSpec((td, f_out), lambda i, k, nblk, blk, att: (i, 0)),
            scratch_shapes=[
                pltpu.VMEM((td, H), jnp.float32),        # running max
                pltpu.VMEM((td, H), jnp.float32),        # running denominator
                pltpu.VMEM((td, ho), jnp.float32),       # per-head output accumulators
            ],
        ),
        compiler_params=pltpu.CompilerParams(
            dimension_semantics=("parallel", "arbitrary"),
            vmem_limit_bytes=_VMEM_LIMIT_BYTES),
    )(nblk, blk_idx, att_flat, xr, xlt, adj_pad, bias_row)


# ---------------------------------------------------------------------------
# Block-sparse tables, parameter init and full forward
# ---------------------------------------------------------------------------
def _build_block_tables(adj_np, n_pad, td, ts):
    """Per-dst-tile lists of nonzero src blocks (DMA-level skip); shared by all layers."""
    n_td, n_ts = n_pad // td, n_pad // ts
    n = adj_np.shape[0]
    full = np.zeros((n_pad, n_pad), dtype=bool)
    full[:n, :n] = adj_np > 0
    blkmask = full.reshape(n_td, td, n_ts, ts).any(axis=(1, 3))     # (n_td, n_ts)
    counts = blkmask.sum(axis=1).astype(np.int32)
    max_nnz = max(int(counts.max()), 1)
    blk_idx = np.zeros((n_td, max_nnz), dtype=np.int32)
    for i in range(n_td):
        nz = np.flatnonzero(blkmask[i])
        blk_idx[i, :nz.size] = nz
        if 0 < nz.size < max_nnz:
            blk_idx[i, nz.size:] = nz[-1]    # padding entries fetch a valid (skipped) block
    return jnp.asarray(counts), jnp.asarray(blk_idx)


def init_gatv2_params(key, in_channels, hidden_channels, num_layers, out_channels, heads):
    params = []
    dim_in = in_channels
    for layer in range(num_layers):
        is_last = layer == num_layers - 1
        if is_last and out_channels is not None:
            concat, o = False, out_channels
        else:
            assert hidden_channels % heads == 0
            concat, o = True, hidden_channels // heads
        key, k1, k2, k3, k4 = jax.random.split(key, 5)
        ho = heads * o
        w_scale = (2.0 / (dim_in + ho)) ** 0.5
        w_l = w_scale * jax.random.normal(k1, (dim_in, ho), jnp.float32)
        w_r = w_scale * jax.random.normal(k2, (dim_in, ho), jnp.float32)
        att = ((2.0 / (o + 1)) ** 0.5) * jax.random.normal(k3, (heads, o), jnp.float32)
        f_out = ho if concat else o
        bias = 0.01 * jax.random.normal(k4, (f_out,), jnp.float32)
        params.append(dict(
            w_l=w_l, w_r=w_r,                                         # f32 originals (reference)
            w_cat=jnp.concatenate([w_l, w_r], axis=1).astype(jnp.bfloat16),  # fused MXU operand
            att=att, bias=bias, out_per_head=o, concat=concat,
            apply_relu=not is_last, f_out=f_out))
        dim_in = f_out
    return params


def gatv2_forward(x, adj, params, heads, *, block_dst=256, block_src=512):
    """GATv2Wrap.forward with `adj` = dense (dst, src) 0/1 mask incl. self loops."""
    n, f_in = x.shape
    tile_lcm = block_dst * block_src // math.gcd(block_dst, block_src)
    n_pad = _round_up(n, tile_lcm)
    td = min(block_dst, n_pad)
    ts = min(block_src, n_pad)

    # Block-sparse tables require a concrete adjacency (built eagerly, not under jit).
    adj_np = np.asarray(jax.device_get(adj))
    nblk, blk_idx = _build_block_tables(adj_np, n_pad, td, ts)

    adj_pad = jnp.zeros((n_pad, n_pad), jnp.int8).at[:n, :n].set(adj.astype(jnp.int8))
    h = jnp.zeros((n_pad, f_in), jnp.bfloat16).at[:n, :].set(x.astype(jnp.bfloat16))

    out, f_out = None, None
    for li, prm in enumerate(params):
        is_last = li == len(params) - 1
        out = gatv2_layer(h, adj_pad, nblk, blk_idx, prm["w_cat"], prm["att"], prm["bias"],
                          heads=heads, out_per_head=prm["out_per_head"],
                          concat=prm["concat"], apply_relu=prm["apply_relu"],
                          out_dtype=jnp.float32 if is_last else jnp.bfloat16,
                          td=td, ts=ts)
        f_out = prm["f_out"]
        h = out                        # hidden layers are already bf16 (written by the kernel)
    return out[:n, :f_out]


# ---------------------------------------------------------------------------
# Pure-JAX reference (f32 math, same bf16 rounding points as the kernel path)
# ---------------------------------------------------------------------------
def _bf16(a):
    return a.astype(jnp.bfloat16).astype(jnp.float32)


def gatv2_reference(x, adj, params, heads):
    mask = adj > 0
    h = _bf16(x)
    out = None
    for prm in params:
        O = prm["out_per_head"]
        xl = _bf16(h @ _bf16(prm["w_l"]))
        xr = _bf16(h @ _bf16(prm["w_r"]))
        outs = []
        for hd in range(heads):
            xl_h = xl[:, hd * O:(hd + 1) * O]
            xr_h = xr[:, hd * O:(hd + 1) * O]
            e = jnp.zeros(mask.shape, jnp.float32)
            for c in range(O):
                t = xr_h[:, c:c + 1] + xl_h[:, c][None, :]
                t = jnp.maximum(t, 0.2 * t)
                e = e + prm["att"][hd, c] * t
            e = jnp.where(mask, e, -1e30)
            e = e - jnp.max(e, axis=1, keepdims=True)
            p = jnp.where(mask, jnp.exp(e), 0.0)
            alpha = p / jnp.maximum(jnp.sum(p, axis=1, keepdims=True), 1e-20)
            outs.append(alpha @ xl_h)
        out = jnp.concatenate(outs, axis=-1) if prm["concat"] else sum(outs) / heads
        out = out + prm["bias"]
        if prm["apply_relu"]:
            out = jnp.maximum(out, 0.0)
            h = _bf16(out)
    return out


def edge_index_to_dense_adj(edge_index, n):
    # Dense (dst, src) mask with self loops (GATv2Conv add_self_loops=True,
    # flow='source_to_target'); edge_index has no duplicates so this matches PyG's sparse path.
    adj = jnp.zeros((n, n), jnp.float32)
    adj = adj.at[edge_index[1], edge_index[0]].set(1.0)
    return jnp.maximum(adj, jnp.eye(n, dtype=jnp.float32))


if __name__ == "__main__":
    N = 700                   # nodes (padded to 1024 -> 4 dst tiles x up to 2 nonzero src blocks)
    in_channels = 8
    hidden_channels = 12
    out_channels = 6
    num_layers = 2
    heads = 3

    key = jax.random.PRNGKey(0)
    kx, kp = jax.random.split(key)
    x = jax.random.normal(kx, (N, in_channels), jnp.float32)          # batch.x

    # batch.edge_index: bidirectional ring plus chords, no self loops, no duplicates.
    src, dst = [], []
    for i in range(N):
        src += [i, (i + 1) % N]
        dst += [(i + 1) % N, i]
    for i in range(0, N, 4):
        src.append(i)
        dst.append((i + 7) % N)
    edge_index = jnp.array([src, dst], dtype=jnp.int32)               # (2, E)

    adj = edge_index_to_dense_adj(edge_index, N)
    params = init_gatv2_params(kp, in_channels, hidden_channels,
                               num_layers, out_channels, heads)

    out = gatv2_forward(x, adj, params, heads)
    out = jax.block_until_ready(out)
    assert out.shape == (N, out_channels)
    assert bool(jnp.all(jnp.isfinite(out)))

    ref = gatv2_reference(x, adj, params, heads)
    err = float(jnp.max(jnp.abs(out - ref)))
    assert err < 5e-2, f"max abs err vs reference: {err}"
    print("KERNEL_OK")
</pallas_src>

<mosaic_0001>
module attributes {stable_mosaic.version = 11 : i64} {
  func.func @kernel(%arg0: i32, %arg1: memref<256x8xbf16, #tpu.memory_space<vmem>>, %arg2: memref<8x24xbf16, #tpu.memory_space<vmem>>, %arg3: memref<256x12xbf16, #tpu.memory_space<vmem>>, %arg4: memref<256x12xbf16, #tpu.memory_space<vmem>>) attributes {dimension_semantics = [#tpu.dimension_semantics<parallel>], iteration_bounds = array<i64: 4>, scalar_prefetch = 0 : i64, scratch_operands = 0 : i64, tpu.core_type = #tpu.core_type<tc>, window_params = [{transform_indices = @transform_0, window_bounds = array<i64: 256, 8>}, {pipeline_mode = #tpu.pipeline_mode<synchronous>, transform_indices = @transform_1, window_bounds = array<i64: 8, 24>}, {transform_indices = @transform_2, window_bounds = array<i64: 256, 12>}, {transform_indices = @transform_3, window_bounds = array<i64: 256, 12>}]} {
    %c0 = arith.constant 0 : index
    %c0_0 = arith.constant 0 : index
    %0 = vector.load %arg1[%c0, %c0_0] : memref<256x8xbf16, #tpu.memory_space<vmem>>, vector<256x8xbf16>
    %c0_1 = arith.constant 0 : index
    %c0_2 = arith.constant 0 : index
    %1 = vector.load %arg2[%c0_1, %c0_2] : memref<8x24xbf16, #tpu.memory_space<vmem>>, vector<8x24xbf16>
    %cst = arith.constant dense<0.000000e+00> : vector<256x24xf32>
    %2 = tpu.matmul %0, %1, %cst {dimension_numbers = #tpu.dot_dimension_numbers<[1], [0], [0], [1], [0, 0, 1, 1], [], []>} : vector<256x8xbf16>, vector<8x24xbf16>, vector<256x24xf32> -> vector<256x24xf32>
    %3 = vector.extract_strided_slice %2 {offsets = [0, 0], sizes = [256, 12], strides = [1, 1]} : vector<256x24xf32> to vector<256x12xf32>
    %4 = arith.truncf %3 : vector<256x12xf32> to vector<256x12xbf16>
    %c0_3 = arith.constant 0 : index
    %c0_4 = arith.constant 0 : index
    %5 = vector.load %arg3[%c0_3, %c0_4] : memref<256x12xbf16, #tpu.memory_space<vmem>>, vector<256x12xbf16>
    tpu.vector_store %arg3[%c0_3, %c0_4], %4 {strides = array<i32>} : memref<256x12xbf16, #tpu.memory_space<vmem>>, vector<256x12xbf16>,
    %6 = vector.extract_strided_slice %2 {offsets = [0, 12], sizes = [256, 12], strides = [1, 1]} : vector<256x24xf32> to vector<256x12xf32>
    %7 = arith.truncf %6 : vector<256x12xf32> to vector<256x12xbf16>
    %c0_5 = arith.constant 0 : index
    %c0_6 = arith.constant 0 : index
    %8 = vector.load %arg4[%c0_5, %c0_6] : memref<256x12xbf16, #tpu.memory_space<vmem>>, vector<256x12xbf16>
    tpu.vector_store %arg4[%c0_5, %c0_6], %7 {strides = array<i32>} : memref<256x12xbf16, #tpu.memory_space<vmem>>, vector<256x12xbf16>,
    return
  }
  func.func @transform_0(%arg0: i32) -> (i32, i32) {
    %c0_i32 = arith.constant 0 : i32
    %c0_i32_0 = arith.constant 0 : i32
    return %arg0, %c0_i32 : i32, i32
  }
  func.func @transform_1(%arg0: i32) -> (i32, i32) {
    %c0_i32 = arith.constant 0 : i32
    %c0_i32_0 = arith.constant 0 : i32
    %c0_i32_1 = arith.constant 0 : i32
    return %c0_i32, %c0_i32_0 : i32, i32
  }
  func.func @transform_2(%arg0: i32) -> (i32, i32) {
    %c0_i32 = arith.constant 0 : i32
    %c0_i32_0 = arith.constant 0 : i32
    return %arg0, %c0_i32 : i32, i32
  }
  func.func @transform_3(%arg0: i32) -> (i32, i32) {
    %c0_i32 = arith.constant 0 : i32
    %c0_i32_0 = arith.constant 0 : i32
    return %arg0, %c0_i32 : i32, i32
  }
}

</mosaic_0001>

<bundles_post_ra>
// kernel: tpu_custom_call.1
= control target key start
LH: loop header
LB: loop body
LE: loop exit
PB: predicated region body
PF: predicated region fallthrough
CT: control target
= control target key end

     0   :  { %s909_s12 = smov 0   ;;  %s1117_s0 = inlined_call_operand.vmem [shape: bf16[1024,8], index: 0, kind: input, shape index: {}]   ;;  %s1118_s1 = inlined_call_operand.vmem [shape: bf16[8,24], index: 1, kind: input, shape index: {}]   ;;  %s1119_s2 = inlined_call_operand.vmem [shape: bf16[1024,12], index: 2, kind: output, shape index: {0}]   ;;  %s1120_s3 = inlined_call_operand.vmem [shape: bf16[1024,12], index: 3, kind: output, shape index: {1}]  }
   0x1 LB: > { %s759_s13 = sadd.s32 4294967295, %s886_s12   ;;  %p763_p0 = scmp.ge.s32.totalorder %s886_s12, 1  ;;  %s886_s12 = sphi %s909_s12, %s14_s12  }
   0x2   : > { %p141_p1 = scmp.lt.s32.totalorder %s886_s12, 5 }
   0x4   : > { %p142_p2 = pnand %p763_p0, %p141_p1 }
   0x5   : > { %s764_s16 = sshll.u32 (!%p142_p2), %s759_s13, 5  ;;  %s888_s24 = smov (!%p142_p2), 116  }
   0x6   : > { %145 = sbr.rel (%p142_p2) target bundleno = 347 (0x15b), region = 28  ;;  %p171_p3 = scmp.lt.s32.totalorder (!%p142_p2), %s764_s16, 127 }
   0xb   : > { %v221_v0 = vld [vmem:[%s1118_s1] sm:$0xf]  ;;  %vm351_vm0 = vcmask 1043456   ;;  %s1122_s16 = smov (!%p171_p3, %s764_s16), 127  ;;  %vm302_vm1 = vcmask 64512   ;;  %vm476_vm2 = vcmask 93184  }
   0xc   : > { %v353_v1 = vsel %vm351_vm0, %v221_v0, 0  ;;  %s920_s17 = sshll.u32 %s1122_s16, 2 }
   0xd   : > { %362 = vmatpush.bf16.msra.mxu0 %v353_v1  ;;  %869 = vmatpush.bf16.msra.mxu2 %v353_v1  ;;  %s174_s20 = scalar_lea.vmem %s1117_s0, %s920_s17  ;;  %s946_s23 = scalar_lea.vmem %s1119_s2, %s920_s17 }
   0xe   : > { %870 = vmatpush.bf16.msra.mxu3 %v353_v1  ;;  %868 = vmatpush.bf16.msra.mxu1 %v353_v1  ;;  %v852_v2 = vld [vmem:[%s174_s20] sm:$0xff]  ;;  %v853_v6 = vld [vmem:[%s174_s20 + $0x8] sm:$0xff]  ;;  %v854_v10 = vld [vmem:[%s174_s20 + $0x10] sm:$0xff]  ;;  %s1048_s27 = scalar_lea.vmem %s1120_s3, %s920_s17 }
   0xf   : > { %v860_v3 = vld [vmem:[%s174_s20 + $0x40] sm:$0xff]  ;;  %v861_v7 = vld [vmem:[%s174_s20 + $0x48] sm:$0xff]  ;;  %v862_v11 = vld [vmem:[%s174_s20 + $0x50] sm:$0xff] }
  0x10   : > { %v864_v4 = vld [vmem:[%s174_s20 + $0x60] sm:$0xff]  ;;  %834 = vmatmul.msk.bf16.vlgmr.msra.gmra.mxu0 %vm302_vm1, %v852_v2  ;;  %842 = vmatmul.msk.bf16.vlgmr.msra.gmra.mxu2 %vm302_vm1, %v860_v3  ;;  %v865_v8 = vld [vmem:[%s174_s20 + $0x68] sm:$0xff]  ;;  %v866_v12 = vld [vmem:[%s174_s20 + $0x70] sm:$0xff] }
  0x11   : > { %v856_v5 = vld [vmem:[%s174_s20 + $0x20] sm:$0xff]  ;;  %846 = vmatmul.msk.bf16.vlgmr.msra.gmra.mxu3 %vm302_vm1, %v864_v4  ;;  %v857_v9 = vld [vmem:[%s174_s20 + $0x28] sm:$0xff]  ;;  %v858_v13 = vld [vmem:[%s174_s20 + $0x30] sm:$0xff] }
  0x12   : > { %838 = vmatmul.msk.bf16.vlgmr.msra.gmra.mxu1 %vm302_vm1, %v856_v5  ;;  %v863_v14 = vld [vmem:[%s174_s20 + $0x58] sm:$0xff] }
  0x13   : > { %v855_v15 = vld [vmem:[%s174_s20 + $0x18] sm:$0xff] }
  0x14   : > { %v859_v16 = vld [vmem:[%s174_s20 + $0x38] sm:$0xff] }
  0x15   : > { %v867_v17 = vld [vmem:[%s174_s20 + $0x78] sm:$0xff] }
  0x20   : > { %835 = vmatmul.msk.bf16.gmra.mxu0 %vm302_vm1, %v853_v6  ;;  %843 = vmatmul.msk.bf16.gmra.mxu2 %vm302_vm1, %v861_v7 }
  0x21   : > { %847 = vmatmul.msk.bf16.gmra.mxu3 %vm302_vm1, %v865_v8 }
  0x22   : > { %839 = vmatmul.msk.bf16.gmra.mxu1 %vm302_vm1, %v857_v9 }
  0x30   : > { %836 = vmatmul.msk.bf16.gmra.mxu0 %vm302_vm1, %v854_v10  ;;  %844 = vmatmul.msk.bf16.gmra.mxu2 %vm302_vm1, %v862_v11 }
  0x31   : > { %848 = vmatmul.msk.bf16.gmra.mxu3 %vm302_vm1, %v866_v12 }
  0x32   : > { %840 = vmatmul.msk.bf16.gmra.mxu1 %vm302_vm1, %v858_v13 }
  0x40   : > { %845 = vmatmul.msk.bf16.gmra.mxu2 %vm302_vm1, %v863_v14  ;;  %837 = vmatmul.msk.bf16.gmra.mxu0 %vm302_vm1, %v855_v15 }
  0x41   : > { %849 = vmatmul.msk.bf16.gmra.mxu3 %vm302_vm1, %v867_v17 }
  0x42   : > { %841 = vmatmul.msk.bf16.gmra.mxu1 %vm302_vm1, %v859_v16 }
  0x8d   : > { %v364_v18 = vpop.f32.mrf.mxu0 }
  0x8e   : > { %v444_v19 = vpack.c.bf16 %v364_v18, %v364_v18 }
  0x8f   : > { %v384_v20 = vpop.f32.mrf.mxu1 }
  0x90   : > { %v452_v21 = vpack.c.bf16 %v384_v20, %v384_v20  ;;  %477 = vst.msk [vmem:[%s946_s23] sm:$0xf] %vm476_vm2, %v444_v19  ;;  %541 = vrot.lane.b32.xlu0 %v444_v19, %s888_s24 }
  0x92   : > { %485 = vst.msk [vmem:[%s946_s23 + $0x20] sm:$0xf] %vm476_vm2, %v452_v21  ;;  %557 = vrot.lane.b32.xlu2 %v452_v21, %s888_s24 }
  0x93   : > { %v404_v22 = vpop.f32.mrf.mxu2 }
  0x94   : > { %v460_v23 = vpack.c.bf16 %v404_v22, %v404_v22  ;;  %v424_v24 = vpop.f32.mrf.mxu3 }
  0x95   : > { %v468_v25 = vpack.c.bf16 %v424_v24, %v424_v24  ;;  %v366_v26 = vpop.f32.mrf.mxu0 }
  0x96   : > { %493 = vst.msk [vmem:[%s946_s23 + $0x40] sm:$0xf] %vm476_vm2, %v460_v23  ;;  %v445_v27 = vpack.c.bf16 %v366_v26, %v366_v26  ;;  %573 = vrot.lane.b32.xlu1 %v460_v23, %s888_s24 }
  0x97   : > { %v386_v28 = vpop.f32.mrf.mxu1  ;;  %501 = vst.msk [vmem:[%s946_s23 + $0x60] sm:$0xf] %vm476_vm2, %v468_v25 }
  0x98   : > { %v453_v29 = vpack.c.bf16 %v386_v28, %v386_v28  ;;  %478 = vst.msk [vmem:[%s946_s23 + $0x4] sm:$0xf] %vm476_vm2, %v445_v27  ;;  %589 = vrot.lane.b32.xlu0 %v468_v25, %s888_s24 }
  0x9a   : > { %486 = vst.msk [vmem:[%s946_s23 + $0x24] sm:$0xf] %vm476_vm2, %v453_v29 }
  0x9b   : > { %v406_v30 = vpop.f32.mrf.mxu2 }
  0x9c   : > { %v461_v31 = vpack.c.bf16 %v406_v30, %v406_v30  ;;  %v426_v32 = vpop.f32.mrf.mxu3 }
  0x9d   : > { %v469_v33 = vpack.c.bf16 %v426_v32, %v426_v32  ;;  %v369_v34 = vpop.f32.mrf.mxu0 }
  0x9e   : > { %494 = vst.msk [vmem:[%s946_s23 + $0x44] sm:$0xf] %vm476_vm2, %v461_v31  ;;  %v446_v35 = vpack.c.bf16 %v369_v34, %v369_v34  ;;  %575 = vrot.lane.b32.xlu2 %v461_v31, %s888_s24 }
  0x9f   : > { %v389_v36 = vpop.f32.mrf.mxu1  ;;  %502 = vst.msk [vmem:[%s946_s23 + $0x64] sm:$0xf] %vm476_vm2, %v469_v33  ;;  %591 = vrot.lane.b32.xlu1 %v469_v33, %s888_s24 }
  0xa0   : > { %v454_v37 = vpack.c.bf16 %v389_v36, %v389_v36  ;;  %479 = vst.msk [vmem:[%s946_s23 + $0x8] sm:$0xf] %vm476_vm2, %v446_v35  ;;  %543 = vrot.lane.b32.xlu0 %v445_v27, %s888_s24 }
  0xa2   : > { %487 = vst.msk [vmem:[%s946_s23 + $0x28] sm:$0xf] %vm476_vm2, %v454_v37 }
  0xa3   : > { %v409_v38 = vpop.f32.mrf.mxu2 }
  0xa4   : > { %v429_v39 = vpop.f32.mrf.mxu3  ;;  %v462_v40 = vpack.c.bf16 %v409_v38, %v409_v38 }
  0xa5   : > { %v470_v41 = vpack.c.bf16 %v429_v39, %v429_v39  ;;  %v371_v42 = vpop.f32.mrf.mxu0 }
  0xa6   : > { %v447_v43 = vpack.c.bf16 %v371_v42, %v371_v42  ;;  %495 = vst.msk [vmem:[%s946_s23 + $0x48] sm:$0xf] %vm476_vm2, %v462_v40 }
  0xa7   : > { %v391_v44 = vpop.f32.mrf.mxu1  ;;  %503 = vst.msk [vmem:[%s946_s23 + $0x68] sm:$0xf] %vm476_vm2, %v470_v41  ;;  %593 = vrot.lane.b32.xlu2 %v470_v41, %s888_s24  ;;  %545 = vrot.lane.b32.xlu1 %v446_v35, %s888_s24 }
  0xa8   : > { %v455_v45 = vpack.c.bf16 %v391_v44, %v391_v44  ;;  %480 = vst.msk [vmem:[%s946_s23 + $0xc] sm:$0xf] %vm476_vm2, %v447_v43  ;;  %559 = vrot.lane.b32.xlu0 %v453_v29, %s888_s24 }
  0xaa   : > { %488 = vst.msk [vmem:[%s946_s23 + $0x2c] sm:$0xf] %vm476_vm2, %v455_v45 }
  0xab   : > { %v411_v46 = vpop.f32.mrf.mxu2 }
  0xac   : > { %v463_v47 = vpack.c.bf16 %v411_v46, %v411_v46  ;;  %v431_v48 = vpop.f32.mrf.mxu3 }
  0xad   : > { %v374_v49 = vpop.f32.mrf.mxu0  ;;  %v471_v50 = vpack.c.bf16 %v431_v48, %v431_v48 }
  0xae   : > { %v448_v51 = vpack.c.bf16 %v374_v49, %v374_v49  ;;  %496 = vst.msk [vmem:[%s946_s23 + $0x4c] sm:$0xf] %vm476_vm2, %v463_v47 }
  0xaf   : > { %v394_v52 = vpop.f32.mrf.mxu1  ;;  %563 = vrot.lane.b32.xlu2 %v455_v45, %s888_s24  ;;  %561 = vrot.lane.b32.xlu1 %v454_v37, %s888_s24  ;;  %504 = vst.msk [vmem:[%s946_s23 + $0x6c] sm:$0xf] %vm476_vm2, %v471_v50 }
  0xb0   : > { %v456_v53 = vpack.c.bf16 %v394_v52, %v394_v52  ;;  %577 = vrot.lane.b32.xlu0 %v462_v40, %s888_s24  ;;  %481 = vst.msk [vmem:[%s946_s23 + $0x10] sm:$0xf] %vm476_vm2, %v448_v51 }
  0xb2   : > { %489 = vst.msk [vmem:[%s946_s23 + $0x30] sm:$0xf] %vm476_vm2, %v456_v53 }
  0xb3   : > { %v414_v54 = vpop.f32.mrf.mxu2 }
  0xb4   : > { %v464_v55 = vpack.c.bf16 %v414_v54, %v414_v54  ;;  %v434_v56 = vpop.f32.mrf.mxu3 }
  0xb5   : > { %v472_v57 = vpack.c.bf16 %v434_v56, %v434_v56  ;;  %v376_v58 = vpop.f32.mrf.mxu0 }
  0xb6   : > { %497 = vst.msk [vmem:[%s946_s23 + $0x50] sm:$0xf] %vm476_vm2, %v464_v55  ;;  %v449_v59 = vpack.c.bf16 %v376_v58, %v376_v58 }
  0xb7   : > { %v396_v60 = vpop.f32.mrf.mxu1  ;;  %547 = vrot.lane.b32.xlu1 %v447_v43, %s888_s24  ;;  %549 = vrot.lane.b32.xlu2 %v448_v51, %s888_s24  ;;  %505 = vst.msk [vmem:[%s946_s23 + $0x70] sm:$0xf] %vm476_vm2, %v472_v57 }
  0xb8   : > { %v457_v61 = vpack.c.bf16 %v396_v60, %v396_v60  ;;  %595 = vrot.lane.b32.xlu0 %v471_v50, %s888_s24  ;;  %482 = vst.msk [vmem:[%s946_s23 + $0x14] sm:$0xf] %vm476_vm2, %v449_v59 }
  0xba   : > { %490 = vst.msk [vmem:[%s946_s23 + $0x34] sm:$0xf] %vm476_vm2, %v457_v61 }
  0xbb   : > { %v416_v62 = vpop.f32.mrf.mxu2 }
  0xbc   : > { %v465_v63 = vpack.c.bf16 %v416_v62, %v416_v62  ;;  %v436_v0 = vpop.f32.mrf.mxu3 }
  0xbd   : > { %v473_v1 = vpack.c.bf16 %v436_v0, %v436_v0  ;;  %v379_v2 = vpop.f32.mrf.mxu0 }
  0xbe   : > { %498 = vst.msk [vmem:[%s946_s23 + $0x54] sm:$0xf] %vm476_vm2, %v465_v63  ;;  %v450_v3 = vpack.c.bf16 %v379_v2, %v379_v2 }
  0xbf   : > { %v399_v4 = vpop.f32.mrf.mxu1  ;;  %579 = vrot.lane.b32.xlu1 %v463_v47, %s888_s24  ;;  %581 = vrot.lane.b32.xlu2 %v464_v55, %s888_s24  ;;  %506 = vst.msk [vmem:[%s946_s23 + $0x74] sm:$0xf] %vm476_vm2, %v473_v1 }
  0xc0   : > { %v458_v5 = vpack.c.bf16 %v399_v4, %v399_v4  ;;  %565 = vrot.lane.b32.xlu0 %v456_v53, %s888_s24  ;;  %483 = vst.msk [vmem:[%s946_s23 + $0x18] sm:$0xf] %vm476_vm2, %v450_v3 }
  0xc2   : > { %491 = vst.msk [vmem:[%s946_s23 + $0x38] sm:$0xf] %vm476_vm2, %v458_v5 }
  0xc3   : > { %v419_v6 = vpop.f32.mrf.mxu2 }
  0xc4   : > { %v466_v7 = vpack.c.bf16 %v419_v6, %v419_v6  ;;  %v439_v8 = vpop.f32.mrf.mxu3 }
  0xc5   : > { %v381_v9 = vpop.f32.mrf.mxu0  ;;  %v474_v10 = vpack.c.bf16 %v439_v8, %v439_v8 }
  0xc6   : > { %499 = vst.msk [vmem:[%s946_s23 + $0x58] sm:$0xf] %vm476_vm2, %v466_v7  ;;  %v451_v11 = vpack.c.bf16 %v381_v9, %v381_v9 }
  0xc7   : > { %v401_v12 = vpop.f32.mrf.mxu1  ;;  %597 = vrot.lane.b32.xlu1 %v472_v57, %s888_s24  ;;  %551 = vrot.lane.b32.xlu2 %v449_v59, %s888_s24  ;;  %507 = vst.msk [vmem:[%s946_s23 + $0x78] sm:$0xf] %vm476_vm2, %v474_v10 }
  0xc8   : > { %v459_v13 = vpack.c.bf16 %v401_v12, %v401_v12  ;;  %583 = vrot.lane.b32.xlu0 %v465_v63, %s888_s24  ;;  %484 = vst.msk [vmem:[%s946_s23 + $0x1c] sm:$0xf] %vm476_vm2, %v451_v11 }
  0xca   : > { %492 = vst.msk [vmem:[%s946_s23 + $0x3c] sm:$0xf] %vm476_vm2, %v459_v13 }
  0xcb   : > { %v421_v14 = vpop.f32.mrf.mxu2 }
  0xcc   : > { %v467_v15 = vpack.c.bf16 %v421_v14, %v421_v14  ;;  %v441_v16 = vpop.f32.mrf.mxu3 }
  0xcd   : > { %v475_v17 = vpack.c.bf16 %v441_v16, %v441_v16 }
  0xce   : > { %500 = vst.msk [vmem:[%s946_s23 + $0x5c] sm:$0xf] %vm476_vm2, %v467_v15 }
  0xcf   : > { %567 = vrot.lane.b32.xlu1 %v457_v61, %s888_s24  ;;  %569 = vrot.lane.b32.xlu2 %v458_v5, %s888_s24  ;;  %508 = vst.msk [vmem:[%s946_s23 + $0x7c] sm:$0xf] %vm476_vm2, %v475_v17 }
  0xd0   : > { %553 = vrot.lane.b32.xlu0 %v450_v3, %s888_s24 }
  0xd7   : > { %585 = vrot.lane.b32.xlu1 %v466_v7, %s888_s24  ;;  %587 = vrot.lane.b32.xlu2 %v467_v15, %s888_s24 }
  0xd8   : > { %571 = vrot.lane.b32.xlu0 %v459_v13, %s888_s24 }
  0xdf   : > { %599 = vrot.lane.b32.xlu2 %v473_v1, %s888_s24  ;;  %555 = vrot.lane.b32.xlu1 %v451_v11, %s888_s24 }
  0xe0   : > { %601 = vrot.lane.b32.xlu0 %v474_v10, %s888_s24 }
  0xe7   : > { %603 = vrot.lane.b32.xlu1 %v475_v17, %s888_s24 }
  0xec   : > { %v558_v18 = vpop.permute.xlu2 %557 }
  0xed   : > { %645 = vst.msk [vmem:[%s1048_s27 + $0x20] sm:$0xf] %vm476_vm2, %v558_v18 }
  0xf8   : > { %v576_v19 = vpop.permute.xlu2 %575 }
  0xf9   : > { %654 = vst.msk [vmem:[%s1048_s27 + $0x44] sm:$0xf] %vm476_vm2, %v576_v19 }
 0x101   : > { %v594_v20 = vpop.permute.xlu2 %593 }
 0x102   : > { %663 = vst.msk [vmem:[%s1048_s27 + $0x68] sm:$0xf] %vm476_vm2, %v594_v20  ;;  %v542_v21 = vpop.permute.xlu0 %541 }
 0x103   : > { %637 = vst.msk [vmem:[%s1048_s27] sm:$0xf] %vm476_vm2, %v542_v21 }
 0x108   : > { %v574_v22 = vpop.permute.xlu1 %573 }
 0x109   : > { %653 = vst.msk [vmem:[%s1048_s27 + $0x40] sm:$0xf] %vm476_vm2, %v574_v22  ;;  %v564_v23 = vpop.permute.xlu2 %563 }
 0x10a   : > { %648 = vst.msk [vmem:[%s1048_s27 + $0x2c] sm:$0xf] %vm476_vm2, %v564_v23  ;;  %v590_v24 = vpop.permute.xlu0 %589 }
 0x10b   : > { %661 = vst.msk [vmem:[%s1048_s27 + $0x60] sm:$0xf] %vm476_vm2, %v590_v24 }
 0x111   : > { %v592_v25 = vpop.permute.xlu1 %591  ;;  %v550_v26 = vpop.permute.xlu2 %549 }
 0x112   : > { %662 = vst.msk [vmem:[%s1048_s27 + $0x64] sm:$0xf] %vm476_vm2, %v592_v25  ;;  %v544_v27 = vpop.permute.xlu0 %543 }
 0x113   : > { %641 = vst.msk [vmem:[%s1048_s27 + $0x10] sm:$0xf] %vm476_vm2, %v550_v26 }
 0x114   : > { %638 = vst.msk [vmem:[%s1048_s27 + $0x4] sm:$0xf] %vm476_vm2, %v544_v27 }
 0x119   : > { %v546_v28 = vpop.permute.xlu1 %545  ;;  %v582_v29 = vpop.permute.xlu2 %581 }
 0x11a   : > { %639 = vst.msk [vmem:[%s1048_s27 + $0x8] sm:$0xf] %vm476_vm2, %v546_v28  ;;  %v560_v30 = vpop.permute.xlu0 %559 }
 0x11b   : > { %657 = vst.msk [vmem:[%s1048_s27 + $0x50] sm:$0xf] %vm476_vm2, %v582_v29 }
 0x11c   : > { %646 = vst.msk [vmem:[%s1048_s27 + $0x24] sm:$0xf] %vm476_vm2, %v560_v30 }
 0x121   : > { %v562_v31 = vpop.permute.xlu1 %561  ;;  %v552_v32 = vpop.permute.xlu2 %551 }
 0x122   : > { %647 = vst.msk [vmem:[%s1048_s27 + $0x28] sm:$0xf] %vm476_vm2, %v562_v31  ;;  %v578_v33 = vpop.permute.xlu0 %577 }
 0x123   : > { %642 = vst.msk [vmem:[%s1048_s27 + $0x14] sm:$0xf] %vm476_vm2, %v552_v32 }
 0x124   : > { %655 = vst.msk [vmem:[%s1048_s27 + $0x48] sm:$0xf] %vm476_vm2, %v578_v33 }
 0x129   : > { %v548_v34 = vpop.permute.xlu1 %547  ;;  %v570_v35 = vpop.permute.xlu2 %569 }
 0x12a   : > { %640 = vst.msk [vmem:[%s1048_s27 + $0xc] sm:$0xf] %vm476_vm2, %v548_v34  ;;  %v596_v36 = vpop.permute.xlu0 %595 }
 0x12b   : > { %651 = vst.msk [vmem:[%s1048_s27 + $0x38] sm:$0xf] %vm476_vm2, %v570_v35 }
 0x12c   : > { %664 = vst.msk [vmem:[%s1048_s27 + $0x6c] sm:$0xf] %vm476_vm2, %v596_v36 }
 0x131   : > { %v580_v37 = vpop.permute.xlu1 %579  ;;  %v588_v38 = vpop.permute.xlu2 %587 }
 0x132   : > { %656 = vst.msk [vmem:[%s1048_s27 + $0x4c] sm:$0xf] %vm476_vm2, %v580_v37  ;;  %v566_v39 = vpop.permute.xlu0 %565 }
 0x133   : > { %660 = vst.msk [vmem:[%s1048_s27 + $0x5c] sm:$0xf] %vm476_vm2, %v588_v38 }
 0x134   : > { %649 = vst.msk [vmem:[%s1048_s27 + $0x30] sm:$0xf] %vm476_vm2, %v566_v39 }
 0x139   : > { %v598_v40 = vpop.permute.xlu1 %597  ;;  %v600_v41 = vpop.permute.xlu2 %599 }
 0x13a   : > { %665 = vst.msk [vmem:[%s1048_s27 + $0x70] sm:$0xf] %vm476_vm2, %v598_v40  ;;  %v584_v42 = vpop.permute.xlu0 %583 }
 0x13b   : > { %666 = vst.msk [vmem:[%s1048_s27 + $0x74] sm:$0xf] %vm476_vm2, %v600_v41 }
 0x13c   : > { %658 = vst.msk [vmem:[%s1048_s27 + $0x54] sm:$0xf] %vm476_vm2, %v584_v42 }
 0x141   : > { %v568_v43 = vpop.permute.xlu1 %567 }
 0x142   : > { %650 = vst.msk [vmem:[%s1048_s27 + $0x34] sm:$0xf] %vm476_vm2, %v568_v43  ;;  %v554_v44 = vpop.permute.xlu0 %553 }
 0x143   : > { %643 = vst.msk [vmem:[%s1048_s27 + $0x18] sm:$0xf] %vm476_vm2, %v554_v44 }
 0x149   : > { %v586_v45 = vpop.permute.xlu1 %585 }
 0x14a   : > { %659 = vst.msk [vmem:[%s1048_s27 + $0x58] sm:$0xf] %vm476_vm2, %v586_v45  ;;  %v572_v46 = vpop.permute.xlu0 %571 }
 0x14b   : > { %652 = vst.msk [vmem:[%s1048_s27 + $0x3c] sm:$0xf] %vm476_vm2, %v572_v46 }
 0x151   : > { %v556_v47 = vpop.permute.xlu1 %555 }
 0x152   : > { %644 = vst.msk [vmem:[%s1048_s27 + $0x1c] sm:$0xf] %vm476_vm2, %v556_v47  ;;  %v602_v48 = vpop.permute.xlu0 %601 }
 0x153   : > { %667 = vst.msk [vmem:[%s1048_s27 + $0x78] sm:$0xf] %vm476_vm2, %v602_v48 }
 0x159   : > { %v604_v49 = vpop.permute.xlu1 %603 }
 0x15a   : > { %668 = vst.msk [vmem:[%s1048_s27 + $0x7c] sm:$0xf] %vm476_vm2, %v604_v49 }
 0x15b PF: > { %s14_s12 = sadd.s32 1, %s886_s12  }
 0x15c   : > { %p11_p4 = scmp.ge.s32.totalorder %s14_s12, 6  }
 0x15e   :  { %13 = sbr.rel (!%p11_p4) target bundleno = 1 (0x1), region = 70 }

</bundles_post_ra>
